<compile_context>
chip_gen: v5e
topology: v5e:2x2
jax: 0.10.0
libtpu: 0.0.40
codegen_flags: <defaults>
</compile_context>

<pallas_src>
import jax
import jax.numpy as jnp
from jax.experimental import pallas as pl
from jax.experimental.pallas import tpu as pltpu


def _round_up(x, m):
    return ((x + m - 1) // m) * m


def _pick_row_tile(n):
    """Row tile: big tiles amortize per-step overhead; keep >=~8 grid steps
    at large N so both v7x TensorCores get work; small N -> one aligned block."""
    if n <= 512:
        return _round_up(max(n, 8), 8)
    tile = _round_up(pl.cdiv(n, 8), 256)
    return max(256, min(2048, tile))


def classifier_kernel(emb_ref, attr_ref, w_attr_ref, b_attr_ref,
                      w1_emb_ref, w1_attr_ref, b1_ref,
                      w2_ref, b2_ref, out_ref):
    emb = emb_ref[...]                                   # (TN, 2H) f32
    attr = attr_ref[...]                                 # (TN, E)  f32

    # edge_attr_lin + ReLU, lane-padded to hp columns (padding stays exactly 0).
    h_attr = jnp.dot(attr, w_attr_ref[...], preferred_element_type=jnp.float32)
    h_attr = jnp.maximum(h_attr + b_attr_ref[...], 0.0)  # (TN, hp) f32

    # classifier_1 on concat([emb, h_attr]) == emb @ W1_emb + h_attr @ W1_attr.
    h = (jnp.dot(emb, w1_emb_ref[...], preferred_element_type=jnp.float32)
         + jnp.dot(h_attr, w1_attr_ref[...], preferred_element_type=jnp.float32)
         + b1_ref[...])
    h = jnp.maximum(h, 0.0)                              # (TN, hp) f32
    # TODO(synk): dropout is identity here (inference / eval mode only).

    # classifier_2 straight into the unpadded (TN, n_out) output block.
    out_ref[...] = (jnp.dot(h, w2_ref[...], preferred_element_type=jnp.float32)
                    + b2_ref[...])


def classifier_forward(emb, attr, params):
    """emb: (N, 2H) f32, attr: (N, E) f32 -> (N, n_out) f32."""
    n, two_h = emb.shape
    e = attr.shape[1]
    w_attr, b_attr, w1, b1, w2, b2 = (params["w_attr"], params["b_attr"],
                                      params["w1"], params["b1"],
                                      params["w2"], params["b2"])
    h = w_attr.shape[1]
    o = w2.shape[1]
    hp = _round_up(h, 128)        # lane-dense hidden width

    f32 = jnp.float32
    # Hidden-width-padded weights/biases. Padded lanes of the biases are zero
    # and padded rows of w1_attr / w2 are zero, so the hp-padding stays inert
    # through ReLU and contributes nothing to the output.
    w_attr_p = jnp.zeros((e, hp), f32).at[:, :h].set(w_attr)
    b_attr_p = jnp.zeros((1, hp), f32).at[:, :h].set(b_attr.reshape(1, h))
    w1_emb_p = jnp.zeros((two_h, hp), f32).at[:, :h].set(w1[:two_h])
    w1_attr_p = jnp.zeros((hp, hp), f32).at[:h, :h].set(w1[two_h:])
    b1_p = jnp.zeros((1, hp), f32).at[:, :h].set(b1.reshape(1, h))
    w2_p = jnp.zeros((hp, o), f32).at[:h, :].set(w2)
    b2_p = b2.reshape(1, o).astype(f32)

    tn = _pick_row_tile(n)
    grid = (pl.cdiv(n, tn),)      # partial last block is bounds-masked by Pallas

    # Weights/biases: same block every grid step -> DMA'd once, VMEM-resident.
    resident = lambda a: pl.BlockSpec(a.shape, lambda i: (0,) * a.ndim)

    out = pl.pallas_call(
        classifier_kernel,
        out_shape=jax.ShapeDtypeStruct((n, o), jnp.float32),
        grid=grid,
        in_specs=[pl.BlockSpec((tn, two_h), lambda i: (i, 0)),   # emb rows
                  pl.BlockSpec((tn, e), lambda i: (i, 0)),       # attr rows
                  resident(w_attr_p), resident(b_attr_p),
                  resident(w1_emb_p), resident(w1_attr_p), resident(b1_p),
                  resident(w2_p), resident(b2_p)],
        out_specs=pl.BlockSpec((tn, o), lambda i: (i, 0)),
        compiler_params=pltpu.CompilerParams(
            dimension_semantics=("parallel",)),
    )(emb, attr, w_attr_p, b_attr_p, w1_emb_p, w1_attr_p, b1_p, w2_p, b2_p)

    return out


def init_params(key, n_hidden, n_edge_attr, n_out):
    """Deterministic synthetic params. Weights stored transposed (in, out)
    so the kernel does x @ W directly (equivalent to PyTorch's x @ W^T)."""
    ks = jax.random.split(key, 6)
    scale = 0.1
    return {
        "w_attr": scale * jax.random.normal(ks[0], (n_edge_attr, n_hidden), jnp.float32),
        "b_attr": scale * jax.random.normal(ks[1], (n_hidden,), jnp.float32),
        "w1":     scale * jax.random.normal(ks[2], (3 * n_hidden, n_hidden), jnp.float32),
        "b1":     scale * jax.random.normal(ks[3], (n_hidden,), jnp.float32),
        "w2":     scale * jax.random.normal(ks[4], (n_hidden, n_out), jnp.float32),
        "b2":     scale * jax.random.normal(ks[5], (n_out,), jnp.float32),
    }


def reference_forward(emb, attr, params):
    h_attr = jax.nn.relu(attr @ params["w_attr"] + params["b_attr"])
    h = jnp.concatenate([emb, h_attr], axis=1)
    h = jax.nn.relu(h @ params["w1"] + params["b1"])
    return h @ params["w2"] + params["b2"]


if __name__ == "__main__":
    n_hidden, n_edge_attr, n_out = 32, 16, 8
    batch = 8

    key = jax.random.PRNGKey(0)
    k_emb, k_attr, k_par = jax.random.split(key, 3)

    emb = jax.random.normal(k_emb, (batch, 2 * n_hidden), jnp.float32)
    attr = jax.random.normal(k_attr, (batch, n_edge_attr), jnp.float32)
    params = init_params(k_par, n_hidden, n_edge_attr, n_out)

    out = classifier_forward(emb, attr, params)
    out = jax.block_until_ready(out)

    ref = reference_forward(emb, attr, params)
    assert out.shape == (batch, n_out)
    # f32 operands with f32 accumulation; small tolerance for MXU rounding.
    assert jnp.allclose(out, ref, atol=1e-2, rtol=1e-2), "mismatch vs reference"

    print("KERNEL_OK")
</pallas_src>

<mosaic_0001>
module attributes {stable_mosaic.version = 11 : i64} {
  func.func @classifier_kernel(%arg0: i32, %arg1: memref<8x64xf32, #tpu.memory_space<vmem>>, %arg2: memref<8x16xf32, #tpu.memory_space<vmem>>, %arg3: memref<16x128xf32, #tpu.memory_space<vmem>>, %arg4: memref<1x128xf32, #tpu.memory_space<vmem>>, %arg5: memref<64x128xf32, #tpu.memory_space<vmem>>, %arg6: memref<128x128xf32, #tpu.memory_space<vmem>>, %arg7: memref<1x128xf32, #tpu.memory_space<vmem>>, %arg8: memref<128x8xf32, #tpu.memory_space<vmem>>, %arg9: memref<1x8xf32, #tpu.memory_space<vmem>>, %arg10: memref<8x8xf32, #tpu.memory_space<vmem>>) attributes {dimension_semantics = [#tpu.dimension_semantics<parallel>], iteration_bounds = array<i64: 1>, scalar_prefetch = 0 : i64, scratch_operands = 0 : i64, tpu.core_type = #tpu.core_type<tc>, window_params = [{transform_indices = @transform_0, window_bounds = array<i64: 8, 64>}, {transform_indices = @transform_1, window_bounds = array<i64: 8, 16>}, {pipeline_mode = #tpu.pipeline_mode<synchronous>, transform_indices = @transform_2, window_bounds = array<i64: 16, 128>}, {pipeline_mode = #tpu.pipeline_mode<synchronous>, transform_indices = @transform_3, window_bounds = array<i64: 1, 128>}, {pipeline_mode = #tpu.pipeline_mode<synchronous>, transform_indices = @transform_4, window_bounds = array<i64: 64, 128>}, {pipeline_mode = #tpu.pipeline_mode<synchronous>, transform_indices = @transform_5, window_bounds = array<i64: 128, 128>}, {pipeline_mode = #tpu.pipeline_mode<synchronous>, transform_indices = @transform_6, window_bounds = array<i64: 1, 128>}, {pipeline_mode = #tpu.pipeline_mode<synchronous>, transform_indices = @transform_7, window_bounds = array<i64: 128, 8>}, {pipeline_mode = #tpu.pipeline_mode<synchronous>, transform_indices = @transform_8, window_bounds = array<i64: 1, 8>}, {transform_indices = @transform_9, window_bounds = array<i64: 8, 8>}]} {
    %c0 = arith.constant 0 : index
    %c0_0 = arith.constant 0 : index
    %0 = vector.load %arg1[%c0, %c0_0] : memref<8x64xf32, #tpu.memory_space<vmem>>, vector<8x64xf32>
    %c0_1 = arith.constant 0 : index
    %c0_2 = arith.constant 0 : index
    %1 = vector.load %arg2[%c0_1, %c0_2] : memref<8x16xf32, #tpu.memory_space<vmem>>, vector<8x16xf32>
    %c0_3 = arith.constant 0 : index
    %c0_4 = arith.constant 0 : index
    %2 = vector.load %arg3[%c0_3, %c0_4] : memref<16x128xf32, #tpu.memory_space<vmem>>, vector<16x128xf32>
    %cst = arith.constant dense<0.000000e+00> : vector<8x128xf32>
    %3 = tpu.matmul %1, %2, %cst {dimension_numbers = #tpu.dot_dimension_numbers<[1], [0], [0], [1], [0, 0, 1, 1], [], []>} : vector<8x16xf32>, vector<16x128xf32>, vector<8x128xf32> -> vector<8x128xf32>
    %c0_5 = arith.constant 0 : index
    %c0_6 = arith.constant 0 : index
    %4 = vector.load %arg4[%c0_5, %c0_6] : memref<1x128xf32, #tpu.memory_space<vmem>>, vector<1x128xf32>
    %5 = vector.broadcast %4 : vector<1x128xf32> to vector<8x128xf32>
    %6 = arith.addf %3, %5 : vector<8x128xf32>
    %cst_7 = arith.constant 0.000000e+00 : f32
    %7 = vector.broadcast %cst_7 : f32 to vector<8x128xf32>
    %8 = arith.maximumf %6, %7 : vector<8x128xf32>
    %c0_8 = arith.constant 0 : index
    %c0_9 = arith.constant 0 : index
    %9 = vector.load %arg5[%c0_8, %c0_9] : memref<64x128xf32, #tpu.memory_space<vmem>>, vector<64x128xf32>
    %cst_10 = arith.constant dense<0.000000e+00> : vector<8x128xf32>
    %10 = tpu.matmul %0, %9, %cst_10 {dimension_numbers = #tpu.dot_dimension_numbers<[1], [0], [0], [1], [0, 0, 1, 1], [], []>} : vector<8x64xf32>, vector<64x128xf32>, vector<8x128xf32> -> vector<8x128xf32>
    %c0_11 = arith.constant 0 : index
    %c0_12 = arith.constant 0 : index
    %11 = vector.load %arg6[%c0_11, %c0_12] : memref<128x128xf32, #tpu.memory_space<vmem>>, vector<128x128xf32>
    %cst_13 = arith.constant dense<0.000000e+00> : vector<8x128xf32>
    %12 = tpu.matmul %8, %11, %cst_13 {dimension_numbers = #tpu.dot_dimension_numbers<[1], [0], [0], [1], [0, 0, 1, 1], [], []>} : vector<8x128xf32>, vector<128x128xf32>, vector<8x128xf32> -> vector<8x128xf32>
    %13 = arith.addf %10, %12 : vector<8x128xf32>
    %c0_14 = arith.constant 0 : index
    %c0_15 = arith.constant 0 : index
    %14 = vector.load %arg7[%c0_14, %c0_15] : memref<1x128xf32, #tpu.memory_space<vmem>>, vector<1x128xf32>
    %15 = vector.broadcast %14 : vector<1x128xf32> to vector<8x128xf32>
    %16 = arith.addf %13, %15 : vector<8x128xf32>
    %cst_16 = arith.constant 0.000000e+00 : f32
    %17 = vector.broadcast %cst_16 : f32 to vector<8x128xf32>
    %18 = arith.maximumf %16, %17 : vector<8x128xf32>
    %c0_17 = arith.constant 0 : index
    %c0_18 = arith.constant 0 : index
    %19 = vector.load %arg8[%c0_17, %c0_18] : memref<128x8xf32, #tpu.memory_space<vmem>>, vector<128x8xf32>
    %cst_19 = arith.constant dense<0.000000e+00> : vector<8x8xf32>
    %20 = tpu.matmul %18, %19, %cst_19 {dimension_numbers = #tpu.dot_dimension_numbers<[1], [0], [0], [1], [0, 0, 1, 1], [], []>} : vector<8x128xf32>, vector<128x8xf32>, vector<8x8xf32> -> vector<8x8xf32>
    %c0_20 = arith.constant 0 : index
    %c0_21 = arith.constant 0 : index
    %21 = vector.load %arg9[%c0_20, %c0_21] : memref<1x8xf32, #tpu.memory_space<vmem>>, vector<1x8xf32>
    %22 = vector.broadcast %21 : vector<1x8xf32> to vector<8x8xf32>
    %23 = arith.addf %20, %22 : vector<8x8xf32>
    %c0_22 = arith.constant 0 : index
    %c0_23 = arith.constant 0 : index
    %24 = vector.load %arg10[%c0_22, %c0_23] : memref<8x8xf32, #tpu.memory_space<vmem>>, vector<8x8xf32>
    tpu.vector_store %arg10[%c0_22, %c0_23], %23 {strides = array<i32>} : memref<8x8xf32, #tpu.memory_space<vmem>>, vector<8x8xf32>,
    return
  }
  func.func @transform_0(%arg0: i32) -> (i32, i32) {
    %c0_i32 = arith.constant 0 : i32
    %c0_i32_0 = arith.constant 0 : i32
    return %arg0, %c0_i32 : i32, i32
  }
  func.func @transform_1(%arg0: i32) -> (i32, i32) {
    %c0_i32 = arith.constant 0 : i32
    %c0_i32_0 = arith.constant 0 : i32
    return %arg0, %c0_i32 : i32, i32
  }
  func.func @transform_2(%arg0: i32) -> (i32, i32) {
    %c0_i32 = arith.constant 0 : i32
    %c0_i32_0 = arith.constant 0 : i32
    %c0_i32_1 = arith.constant 0 : i32
    return %c0_i32, %c0_i32_0 : i32, i32
  }
  func.func @transform_3(%arg0: i32) -> (i32, i32) {
    %c0_i32 = arith.constant 0 : i32
    %c0_i32_0 = arith.constant 0 : i32
    %c0_i32_1 = arith.constant 0 : i32
    return %c0_i32, %c0_i32_0 : i32, i32
  }
  func.func @transform_4(%arg0: i32) -> (i32, i32) {
    %c0_i32 = arith.constant 0 : i32
    %c0_i32_0 = arith.constant 0 : i32
    %c0_i32_1 = arith.constant 0 : i32
    return %c0_i32, %c0_i32_0 : i32, i32
  }
  func.func @transform_5(%arg0: i32) -> (i32, i32) {
    %c0_i32 = arith.constant 0 : i32
    %c0_i32_0 = arith.constant 0 : i32
    %c0_i32_1 = arith.constant 0 : i32
    return %c0_i32, %c0_i32_0 : i32, i32
  }
  func.func @transform_6(%arg0: i32) -> (i32, i32) {
    %c0_i32 = arith.constant 0 : i32
    %c0_i32_0 = arith.constant 0 : i32
    %c0_i32_1 = arith.constant 0 : i32
    return %c0_i32, %c0_i32_0 : i32, i32
  }
  func.func @transform_7(%arg0: i32) -> (i32, i32) {
    %c0_i32 = arith.constant 0 : i32
    %c0_i32_0 = arith.constant 0 : i32
    %c0_i32_1 = arith.constant 0 : i32
    return %c0_i32, %c0_i32_0 : i32, i32
  }
  func.func @transform_8(%arg0: i32) -> (i32, i32) {
    %c0_i32 = arith.constant 0 : i32
    %c0_i32_0 = arith.constant 0 : i32
    %c0_i32_1 = arith.constant 0 : i32
    return %c0_i32, %c0_i32_0 : i32, i32
  }
  func.func @transform_9(%arg0: i32) -> (i32, i32) {
    %c0_i32 = arith.constant 0 : i32
    %c0_i32_0 = arith.constant 0 : i32
    return %arg0, %c0_i32 : i32, i32
  }
}

</mosaic_0001>

<bundles_post_ra>
// kernel: tpu_custom_call.1
= control target key start
LH: loop header
LB: loop body
LE: loop exit
PB: predicated region body
PF: predicated region fallthrough
CT: control target
= control target key end

     0   :  { %14 = vsyncpa [#allocation3], 0  ;;  %s534_s0 = inlined_call_operand.vmem [shape: f32[8,64], index: 0, kind: input, shape index: {}]   ;;  %s535_s1 = inlined_call_operand.hbm [shape: f32[8,16], index: 1, kind: input, shape index: {}]   ;;  %s536_s2 = inlined_call_operand.hbm [shape: f32[16,128], index: 2, kind: input, shape index: {}]   ;;  %s537_s3 = inlined_call_operand.vmem [shape: f32[1,128], index: 3, kind: input, shape index: {}]   ;;  %s538_s4 = inlined_call_operand.hbm [shape: f32[64,128], index: 4, kind: input, shape index: {}]   ;;  %s539_s5 = inlined_call_operand.vmem [shape: f32[128,128], index: 5, kind: input, shape index: {}]   ;;  %s540_s6 = inlined_call_operand.vmem [shape: f32[1,128], index: 6, kind: input, shape index: {}]   ;;  %s541_s7 = inlined_call_operand.vmem [shape: f32[128,8], index: 7, kind: input, shape index: {}]   ;;  %s542_s8 = inlined_call_operand.vmem [shape: f32[1,8], index: 8, kind: input, shape index: {}]   ;;  %s543_s9 = inlined_call_operand.hbm [shape: f32[8,8], index: 9, kind: output, shape index: {}]  }
   0x1   :  { %15 = vsyncpa [#allocation6], 0  ;;  %s34_s11 = sshll.u32 %s536_s2, 4  ;;  %s35_s11 = int_to_ptr.hbm [resolvable:$true] %s34_s11 }
   0x2   :  { %16 = vsyncpa [#allocation4], 0  ;;  %s358_s12 = smov [#allocation5]   ;;  %s24_s16 = sshll.u32 %s535_s1, 4  ;;  %s25_s16 = int_to_ptr.hbm [resolvable:$true] %s24_s16 }
   0x3   :  { %s36_s13 = sshll.u32 %s358_s12, 4  ;;  %s359_s17 = smov 128   ;;  %s37_s13 = int_to_ptr.vmem [resolvable:$true] %s36_s13 }
   0x4   :  { %s360_s18 = smov 8   ;;  %s361_s19 = smov [#allocation2]  }
   0x5   :  { %42 = dma.hbm_to_vmem [thread:$0]  %s35_s11, 256, %s37_s13, [#allocation6], %s359_s17, %s359_s17, %s360_s18  }
   0x6   :  { %s26_s20 = sshll.u32 %s361_s19, 4  ;;  %s49_s23 = sshll.u32 %s538_s4, 4  ;;  %s27_s20 = int_to_ptr.vmem [resolvable:$true] %s26_s20  ;;  %s50_s23 = int_to_ptr.hbm [resolvable:$true] %s49_s23 }
   0x7   :  { %29 = dma.hbm_to_vmem [thread:$0]  %s25_s16, 128, %s27_s20, [#allocation3]  }
   0x8   :  { %s362_s2 = smov [#allocation7]  }
   0x9   :  { %s51_s24 = sshll.u32 %s362_s2, 4  ;;  %s52_s24 = int_to_ptr.vmem [resolvable:$true] %s51_s24 }
   0xa   :  { %57 = dma.hbm_to_vmem [thread:$0]  %s50_s23, 1024, %s52_s24, [#allocation6], %s359_s17, %s359_s17, %s360_s18  }
   0xb   :  { %352 = dma.done.wait [#allocation3], 128  }
   0xc   :  { %353 = vsyncadd [#allocation3], 4294967168 }
   0xd   :  { %354 = dma.done.wait [#allocation6], 1280  }
   0xe   :  { %355 = vsyncadd [#allocation6], 4294966016  ;;  %v81_v0 = vld [vmem:[#allocation5 + $0x8] sm:$0xff]  ;;  %v80_v1 = vld [vmem:[#allocation5] sm:$0xff]  ;;  %vm86_vm0 = vcmask 130048   ;;  %vm155_vm1 = vcmask 523264  }
   0xf   :  { %104 = vmatpush.msra.mxu0 %v81_v0  ;;  %v79_v2 = vld [vmem:[#allocation2] sm:$0xff]  ;;  %v134_v3 = vld [vmem:[%s539_s5 + $0x78] sm:$0xff]  ;;  %v133_v4 = vld [vmem:[%s539_s5 + $0x70] sm:$0xff]  ;;  %s363_s21 = smov [#allocation8]   ;;  %s234_s2 = sshll.u32 %s543_s9, 4  ;;  %vm225_vm2 = vcmask 64512   ;;  %s235_s2 = int_to_ptr.hbm [resolvable:$true] %s234_s2 }
  0x10   :  { %135 = vmatpush.msra.mxu1 %v134_v3  ;;  %v132_v5 = vld [vmem:[%s539_s5 + $0x68] sm:$0xff]  ;;  %v118_v6 = vld [vmem:[#allocation7 + $0x38] sm:$0xff]  ;;  %v131_v8 = vld [vmem:[%s539_s5 + $0x60] sm:$0xff]  ;;  %s232_s22 = sshll.u32 %s363_s21, 4  ;;  %s233_s22 = int_to_ptr.vmem [resolvable:$true] %s232_s22 }
  0x11   :  { %105 = vmatpush.msra.mxu0 %v80_v1  ;;  %v117_v7 = vld [vmem:[#allocation7 + $0x30] sm:$0xff]  ;;  %167 = vmatpush.msra.mxu2 %v118_v6  ;;  %v116_v9 = vld [vmem:[#allocation7 + $0x28] sm:$0xff]  ;;  %v130_v10 = vld [vmem:[%s539_s5 + $0x58] sm:$0xff] }
  0x12   :  { %245 = vmatmul.msk.f32.vlgmr.msra.gmra.mxu0 %vm86_vm0, %v79_v2  ;;  %136 = vmatpush.msra.mxu1 %v133_v4  ;;  %v115_v11 = vld [vmem:[#allocation7 + $0x20] sm:$0xff]  ;;  %v129_v12 = vld [vmem:[%s539_s5 + $0x50] sm:$0xff]  ;;  %v128_v14 = vld [vmem:[%s539_s5 + $0x48] sm:$0xff] }
  0x13   :  { %168 = vmatpush.msra.mxu2 %v117_v7  ;;  %v114_v13 = vld [vmem:[#allocation7 + $0x18] sm:$0xff]  ;;  %v113_v15 = vld [vmem:[#allocation7 + $0x10] sm:$0xff]  ;;  %v127_v16 = vld [vmem:[%s539_s5 + $0x40] sm:$0xff] }
  0x14   :  { %137 = vmatpush.msra.mxu1 %v132_v5  ;;  %v112_v17 = vld [vmem:[#allocation7 + $0x8] sm:$0xff]  ;;  %v126_v18 = vld [vmem:[%s539_s5 + $0x38] sm:$0xff]  ;;  %v125_v20 = vld [vmem:[%s539_s5 + $0x30] sm:$0xff] }
  0x15   :  { %169 = vmatpush.msra.mxu2 %v116_v9  ;;  %v111_v19 = vld [vmem:[#allocation7] sm:$0xff]  ;;  %v78_v21 = vld [vmem:[%s534_s0] sm:$0xff]  ;;  %v124_v22 = vld [vmem:[%s539_s5 + $0x28] sm:$0xff] }
  0x16   :  { %138 = vmatpush.msra.mxu1 %v131_v8  ;;  %v123_v23 = vld [vmem:[%s539_s5 + $0x20] sm:$0xff]  ;;  %v122_v24 = vld [vmem:[%s539_s5 + $0x18] sm:$0xff]  ;;  %v121_v25 = vld [vmem:[%s539_s5 + $0x10] sm:$0xff] }
  0x17   :  { %170 = vmatpush.msra.mxu2 %v115_v11  ;;  %v120_v26 = vld [vmem:[%s539_s5 + $0x8] sm:$0xff]  ;;  %v119_v27 = vld [vmem:[%s539_s5] sm:$0xff]  ;;  %v200_v28 = vld [vmem:[%s541_s7 + $0x78] sm:$0xff] }
  0x18   :  { %139 = vmatpush.msra.mxu1 %v130_v10  ;;  %v199_v29 = vld [vmem:[%s541_s7 + $0x70] sm:$0xff]  ;;  %205 = vmatpush.msra.mxu3 %v200_v28  ;;  %v198_v30 = vld [vmem:[%s541_s7 + $0x68] sm:$0xff]  ;;  %v197_v31 = vld [vmem:[%s541_s7 + $0x60] sm:$0xff] }
  0x19   :  { %171 = vmatpush.msra.mxu2 %v114_v13  ;;  %v196_v32 = vld [vmem:[%s541_s7 + $0x58] sm:$0xff]  ;;  %v195_v33 = vld [vmem:[%s541_s7 + $0x50] sm:$0xff]  ;;  %v194_v34 = vld [vmem:[%s541_s7 + $0x48] sm:$0xff] }
  0x1a   :  { %140 = vmatpush.msra.mxu1 %v129_v12  ;;  %206 = vmatpush.msra.mxu3 %v199_v29  ;;  %v193_v35 = vld [vmem:[%s541_s7 + $0x40] sm:$0xff]  ;;  %v192_v36 = vld [vmem:[%s541_s7 + $0x38] sm:$0xff]  ;;  %v191_v37 = vld [vmem:[%s541_s7 + $0x30] sm:$0xff] }
  0x1b   :  { %172 = vmatpush.msra.mxu2 %v113_v15  ;;  %v190_v38 = vld [vmem:[%s541_s7 + $0x28] sm:$0xff]  ;;  %v189_v39 = vld [vmem:[%s541_s7 + $0x20] sm:$0xff]  ;;  %v188_v44 = vld [vmem:[%s541_s7 + $0x18] sm:$0xff] }
  0x1c   :  { %141 = vmatpush.msra.mxu1 %v128_v14  ;;  %207 = vmatpush.msra.mxu3 %v198_v30  ;;  %v253_v40 = vld [vmem:[%s537_s3] ss:$0 sm:$0xff]  ;;  %v187_v45 = vld [vmem:[%s541_s7 + $0x10] sm:$0xff]  ;;  %v186_v46 = vld [vmem:[%s541_s7 + $0x8] sm:$0xff] }
  0x1d   :  { %173 = vmatpush.msra.mxu2 %v112_v17  ;;  %v185_v47 = vld [vmem:[%s541_s7] sm:$0xff] }
  0x1e   :  { %142 = vmatpush.msra.mxu1 %v127_v16  ;;  %208 = vmatpush.msra.mxu3 %v197_v31  ;;  %v254_v49 = vld [vmem:[%s540_s6] ss:$0 sm:$0xff] }
  0x1f   :  { %174 = vmatpush.msra.mxu2 %v111_v19  ;;  %v255_v54 = vld [vmem:[%s542_s8] ss:$0 sm:$0xff] }
  0x20   :  { %143 = vmatpush.msra.mxu1 %v126_v18  ;;  %246 = vmatmul.msk.f32.vlgmr.msra.gmra.mxu2 %vm155_vm1, %v78_v21 }
  0x21   :  { %209 = vmatpush.msra.mxu3 %v196_v32 }
  0x22   :  { %144 = vmatpush.msra.mxu1 %v125_v20 }
  0x23   :  { %210 = vmatpush.msra.mxu3 %v195_v33 }
  0x24   :  { %145 = vmatpush.msra.mxu1 %v124_v22 }
  0x25   :  { %211 = vmatpush.msra.mxu3 %v194_v34 }
  0x26   :  { %146 = vmatpush.msra.mxu1 %v123_v23 }
  0x27   :  { %212 = vmatpush.msra.mxu3 %v193_v35 }
  0x28   :  { %147 = vmatpush.msra.mxu1 %v122_v24 }
  0x29   :  { %213 = vmatpush.msra.mxu3 %v192_v36 }
  0x2a   :  { %148 = vmatpush.msra.mxu1 %v121_v25 }
  0x2b   :  { %214 = vmatpush.msra.mxu3 %v191_v37 }
  0x2c   :  { %149 = vmatpush.msra.mxu1 %v120_v26 }
  0x2d   :  { %215 = vmatpush.msra.mxu3 %v190_v38 }
  0x2e   :  { %150 = vmatpush.msra.mxu1 %v119_v27 }
  0x2f   :  { %216 = vmatpush.msra.mxu3 %v189_v39 }
  0x31   :  { %217 = vmatpush.msra.mxu3 %v188_v44 }
  0x33   :  { %218 = vmatpush.msra.mxu3 %v187_v45 }
  0x35   :  { %219 = vmatpush.msra.mxu3 %v186_v46 }
  0x37   :  { %220 = vmatpush.msra.mxu3 %v185_v47 }
  0x8f   :  { %v107_v41 = vpop.f32.mrf.mxu0 }
  0x90   :  { %v108_v42 = vadd.f32 %v253_v40, %v107_v41 }
  0x92   :  { %v110_v43 = vmax.f32 %v108_v42, 0.0 }
  0x94   :  { %151 = vmatmul.f32.vlgmr.msra.gmra.mxu1 %v110_v43 }
  0xa3   :  { %v176_v48 = vpop.f32.mrf.mxu2 }
 0x111   :  { %v152_v50 = vpop.f32.mrf.mxu1 }
 0x112   :  { %v177_v51 = vadd.f32 %v176_v48, %v152_v50 }
 0x114   :  { %v183_v52 = vadd.f32 %v254_v49, %v177_v51 }
 0x116   :  { %v184_v53 = vmax.f32 %v183_v52, 0.0 }
 0x118   :  { %221 = vmatmul.f32.vlgmr.msra.gmra.mxu3 %v184_v53 }
 0x19b   :  { %v222_v55 = vpop.f32.mrf.mxu3 }
 0x19c   :  { %v223_v56 = vadd.f32 %v255_v54, %v222_v55 }
 0x19e   :  { %226 = vst.msk [vmem:[#allocation8] sm:$0xff] %vm225_vm2, %v223_v56 }
 0x19f   :  { %237 = dma.vmem_to_hbm [thread:$0]  %s233_s22, 128, %s235_s2, [#allocation4]  }
 0x1a0   :  { %356 = dma.done.wait [#allocation4], 128  }
 0x1a1   :  { %357 = vsyncadd [#allocation4], 4294967168 }
 0x1a2   :  { %242 = vsyncpa [#allocation3], 1 }
 0x1a3   :  { %243 = vsyncpa [#allocation6], 1 }
 0x1a4   :  { %244 = vsyncpa [#allocation4], 1 }

</bundles_post_ra>
